<compile_context>
chip_gen: v5e
topology: v5e:2x2
jax: 0.10.0
libtpu: 0.0.40
codegen_flags: <defaults>
</compile_context>

<pallas_src>
import functools

import jax
import jax.numpy as jnp
from jax.experimental import pallas as pl
from jax.experimental.pallas import tpu as pltpu


def _round_up(x: int, m: int) -> int:
    return (x + m - 1) // m * m


def logreg_kernel(params_ref, x_ref, o_ref):
    """params_ref: (F+1,) f32 in SMEM  ->  [w_0 .. w_{F-1}, b]
       x_ref:      (F, TILE_N) f32 in VMEM (feature-major, lane-dense)
       o_ref:      (1, TILE_N) f32 in VMEM (lane-dense)
    """
    feat = x_ref.shape[0]
    # z = x @ W.T + b done as F scalar*vector multiply-adds on the VPU.
    z = x_ref[0:1, :] * params_ref[0]
    for j in range(1, feat):                 # unrolled at trace time (F == 2)
        z = z + x_ref[j:j + 1, :] * params_ref[j]
    z = z + params_ref[feat]                 # bias

    # Numerically-stable sigmoid: exp never overflows (arg <= 0), and both exp
    # and the approx reciprocal ride the EUP slot, keeping VALU/load slots free.
    e = jnp.exp(-jnp.abs(z))                 # in (0, 1]
    r = pl.reciprocal(1.0 + e, approx=True)  # ~ 1 / (1 + e)
    o_ref[...] = jnp.where(z >= 0.0, r, e * r)


@functools.partial(jax.jit, static_argnames=("tile_n",))
def logreg_forward(x, w, b, tile_n=8192):
    """sigmoid(x @ w.T + b).  x: (N, F) f32, w: (1, F) f32, b: (1,) f32 -> (N, 1) f32"""
    n, feat = x.shape

    # Lane-dense tiling over the batch: batch on lanes, features on sublanes.
    # The wrapper-side transpose/zero-pad is a single cheap XLA relayout; it
    # keeps every in-kernel load / compute / store unmasked and lane-dense.
    tile_n = max(128, min(tile_n, _round_up(n, 128)))   # multiple of 128 lanes
    n_pad = _round_up(n, tile_n)
    x_fm = jnp.zeros((feat, n_pad), jnp.float32).at[:, :n].set(x.T.astype(jnp.float32))
    params = jnp.concatenate([w.reshape(-1), b.reshape(-1)]).astype(jnp.float32)

    num_tiles = n_pad // tile_n
    out = pl.pallas_call(
        logreg_kernel,
        out_shape=jax.ShapeDtypeStruct((1, n_pad), jnp.float32),
        grid=(num_tiles,),
        in_specs=[
            # Scalars live in SMEM: no (8,128)-padded VMEM block, no vector loads.
            pl.BlockSpec(memory_space=pltpu.MemorySpace.SMEM),
            # x tile (F, TILE_N): double-buffered by the Pallas pipeline.
            pl.BlockSpec((feat, tile_n), lambda i: (0, i)),
        ],
        # Lane-dense output row per grid step -> full-width unmasked stores.
        out_specs=pl.BlockSpec((1, tile_n), lambda i: (0, i)),
        compiler_params=pltpu.CompilerParams(
            dimension_semantics=("parallel",)),   # batch tiles are independent
    )(params, x_fm)

    # (1, n_pad) -> (n_pad, 1), drop padding rows (row-major contiguous).
    return out.reshape(n_pad, 1)[:n]


if __name__ == "__main__":
    # Input from the original script: shape (3, 2) f32.
    x = jnp.array([[1.0, 3.0], [2.0, 5.0], [3.0, 6.0]], dtype=jnp.float32)

    # Deterministic nn.Linear(2, 1)-style init: U(-1/sqrt(2), 1/sqrt(2)).
    key = jax.random.PRNGKey(0)
    kw, kb, kx = jax.random.split(key, 3)
    bound = 1.0 / jnp.sqrt(2.0)
    w = jax.random.uniform(kw, (1, 2), minval=-bound, maxval=bound, dtype=jnp.float32)
    b = jax.random.uniform(kb, (1,), minval=-bound, maxval=bound, dtype=jnp.float32)

    y = logreg_forward(x, w, b)
    jax.block_until_ready(y)
    y_ref = jax.nn.sigmoid(x @ w.T + b)
    assert y.shape == (3, 1)
    assert jnp.allclose(y, y_ref, atol=2e-3, rtol=2e-3), (y, y_ref)

    # Second check exercising the multi-tile (grid > 1) pipelined path.
    x_big = jax.random.normal(kx, (300, 2), dtype=jnp.float32)
    y_big = logreg_forward(x_big, w, b, tile_n=128)      # 3 grid steps
    jax.block_until_ready(y_big)
    y_big_ref = jax.nn.sigmoid(x_big @ w.T + b)
    assert y_big.shape == (300, 1)
    assert jnp.allclose(y_big, y_big_ref, atol=2e-3, rtol=2e-3), "multi-tile mismatch"

    print("KERNEL_OK")
</pallas_src>

<mosaic_0001>
module attributes {stable_mosaic.version = 11 : i64} {
  func.func @logreg_kernel(%arg0: i32, %arg1: memref<3xf32, #tpu.memory_space<smem>>, %arg2: memref<2x128xf32, #tpu.memory_space<vmem>>, %arg3: memref<1x128xf32, #tpu.memory_space<vmem>>) attributes {dimension_semantics = [#tpu.dimension_semantics<parallel>], iteration_bounds = array<i64: 1>, scalar_prefetch = 0 : i64, scratch_operands = 0 : i64, tpu.core_type = #tpu.core_type<tc>, window_params = [{transform_indices = @transform_0, window_bounds = array<i64: 3>}, {transform_indices = @transform_1, window_bounds = array<i64: 2, 128>}, {transform_indices = @transform_2, window_bounds = array<i64: 1, 128>}]} {
    %c0 = arith.constant 0 : index
    %c0_0 = arith.constant 0 : index
    %0 = vector.load %arg2[%c0, %c0_0] : memref<2x128xf32, #tpu.memory_space<vmem>>, vector<1x128xf32>
    %c0_1 = arith.constant 0 : index
    %1 = memref.load %arg1[%c0_1] : memref<3xf32, #tpu.memory_space<smem>>
    %2 = vector.broadcast %1 : f32 to vector<1x128xf32>
    %3 = arith.mulf %0, %2 : vector<1x128xf32>
    %c1 = arith.constant 1 : index
    %c0_2 = arith.constant 0 : index
    %4 = vector.load %arg2[%c1, %c0_2] : memref<2x128xf32, #tpu.memory_space<vmem>>, vector<1x128xf32>
    %c1_3 = arith.constant 1 : index
    %5 = memref.load %arg1[%c1_3] : memref<3xf32, #tpu.memory_space<smem>>
    %6 = vector.broadcast %5 : f32 to vector<1x128xf32>
    %7 = arith.mulf %4, %6 : vector<1x128xf32>
    %8 = arith.addf %3, %7 : vector<1x128xf32>
    %c2 = arith.constant 2 : index
    %9 = memref.load %arg1[%c2] : memref<3xf32, #tpu.memory_space<smem>>
    %10 = vector.broadcast %9 : f32 to vector<1x128xf32>
    %11 = arith.addf %8, %10 : vector<1x128xf32>
    %12 = math.absf %11 : vector<1x128xf32>
    %cst = arith.constant 0.000000e+00 : f32
    %13 = vector.broadcast %cst : f32 to vector<1x128xf32>
    %14 = arith.subf %13, %12 : vector<1x128xf32>
    %15 = math.exp %14 : vector<1x128xf32>
    %cst_4 = arith.constant 1.000000e+00 : f32
    %16 = vector.broadcast %cst_4 : f32 to vector<1x128xf32>
    %17 = arith.addf %16, %15 : vector<1x128xf32>
    %18 = tpu.reciprocal %17 {approx = true} : vector<1x128xf32> -> vector<1x128xf32>
    %cst_5 = arith.constant 0.000000e+00 : f32
    %19 = vector.broadcast %cst_5 : f32 to vector<1x128xf32>
    %20 = arith.cmpf oge, %11, %19 : vector<1x128xf32>
    %21 = arith.mulf %15, %18 : vector<1x128xf32>
    %22 = arith.select %20, %18, %21 : vector<1x128xi1>, vector<1x128xf32>
    %c0_6 = arith.constant 0 : index
    %c0_7 = arith.constant 0 : index
    %23 = vector.load %arg3[%c0_6, %c0_7] : memref<1x128xf32, #tpu.memory_space<vmem>>, vector<1x128xf32>
    tpu.vector_store %arg3[%c0_6, %c0_7], %22 {strides = array<i32>} : memref<1x128xf32, #tpu.memory_space<vmem>>, vector<1x128xf32>,
    return
  }
  func.func @transform_0(%arg0: i32) -> i32 {
    %c0_i32 = arith.constant 0 : i32
    %c0_i32_0 = arith.constant 0 : i32
    return %c0_i32 : i32
  }
  func.func @transform_1(%arg0: i32) -> (i32, i32) {
    %c0_i32 = arith.constant 0 : i32
    %c0_i32_0 = arith.constant 0 : i32
    return %c0_i32, %arg0 : i32, i32
  }
  func.func @transform_2(%arg0: i32) -> (i32, i32) {
    %c0_i32 = arith.constant 0 : i32
    %c0_i32_0 = arith.constant 0 : i32
    return %c0_i32, %arg0 : i32, i32
  }
}

</mosaic_0001>

<bundles_post_ra>
// kernel: logreg_forward.1
= control target key start
LH: loop header
LB: loop body
LE: loop exit
PB: predicated region body
PF: predicated region fallthrough
CT: control target
= control target key end

     0   :  { %7 = vsyncpa [#allocation3], 0  ;;  %s72_s12 = smov [#allocation2]   ;;  %s100_s0 = inlined_call_operand.vmem [shape: f32[3], index: 0, kind: input, shape index: {}]   ;;  %s101_s1 = inlined_call_operand.vmem [shape: f32[2,128], index: 1, kind: input, shape index: {}]   ;;  %s102_s2 = inlined_call_operand.vmem [shape: f32[1,128], index: 2, kind: output, shape index: {}]  }
   0x1   :  { %s13_s11 = sshll.u32 %s100_s0, 4  ;;  %s14_s11 = int_to_ptr.vmem [resolvable:$true] %s13_s11 }
   0x2   :  { %16 = dma.vmem_to_smem %s14_s11, 16, %s72_s12, [#allocation3]  }
   0x3   :  { %70 = dma.done.wait [#allocation3], 16  }
   0x4   :  { %71 = vsyncadd [#allocation3], 4294967280 }
   0x5   :  { %23 = sfence }
   0x6   :  { %s25_s13 = sld [smem:[#allocation2]]  ;;  %v24_v0 = vld [vmem:[%s101_s1] sm:$0x1]  ;;  %v28_v1 = vld [vmem:[%s101_s1 + $0x1] sm:$0x1] }
   0x7   :  { %s51_s14 = sld [smem:[#allocation2 + $0x1]] }
   0x8   :  { %s52_s15 = sld [smem:[#allocation2 + $0x2]] }
   0xc   :  { %v26_v2 = vstv %s25_s13 }
   0xd   :  { %v27_v3 = vmul.f32 %v26_v2, %v24_v0  ;;  %v30_v4 = vstv %s51_s14 }
   0xe   :  { %v31_v5 = vmul.f32 %v30_v4, %v28_v1  ;;  %v34_v6 = vstv %s52_s15 }
  0x10   :  { %v32_v7 = vadd.f32 %v31_v5, %v27_v3 }
  0x12   :  { %v35_v8 = vadd.f32 %v34_v6, %v32_v7 }
  0x14   :  { %v36_v9 = vand.u32 2147483647, %v35_v8  ;;  %vm42_vm0 = vcmp.ge.f32.partialorder %v35_v8, 0.0 }
  0x16   :  { %v37_v10 = vsub.f32 0.0, %v36_v9 }
  0x18   :  { %v38_v11 = vmul.f32 1.442695, %v37_v10 }
  0x1a   :  { %54 = vpow2.f32 %v38_v11 }
  0x20   :  { %v55_v12 = vpop.eup %54 }
  0x21   :  { %v40_v13 = vadd.f32 1.0, %v55_v12 }
  0x23   :  { %56 = vrcp.f32 %v40_v13 }
  0x29   :  { %v57_v14 = vpop.eup %56 }
  0x2a   :  { %v43_v15 = vmul.f32 %v57_v14, %v55_v12 }
  0x2c   :  { %v44_v16 = vsel %vm42_vm0, %v57_v14, %v43_v15 }
  0x2d   :  { %45 = vst [vmem:[%s102_s2] sm:$0x1] %v44_v16 }
  0x2e   :  { %50 = vsyncpa [#allocation3], 1 }

</bundles_post_ra>
